<compile_context>
chip_gen: v6e
topology: v6e:2x2x1
jax: 0.10.0
libtpu: 0.0.40
codegen_flags: <defaults>
</compile_context>

<pallas_src>
import jax
import jax.numpy as jnp
from jax.experimental import pallas as pl
from jax.experimental.pallas import tpu as pltpu

EMB_DIM = 32                     # cfg["emb_dim"]; divisible by num_heads=4
NUM_LEVELS = 5                   # 5 visual feature levels / 5 attention layers
AGG_DIM = NUM_LEVELS * EMB_DIM   # 160
MLP_H1 = 64                      # mlp_hidden_dim_1
MLP_H2 = 32                      # mlp_hidden_dim_2
OUT_DIM = 4                      # bbox regression output
OUT_PAD = 128                    # lane-dense padded output width
B = 2                            # batch size


def vg_kernel(x_ref, w1_ref, b1_ref, w2_ref, b2_ref, w3_ref, b3_ref, out_ref):
    """Fused VGModel head: 3 lane-dense MXU matmuls, intermediates in vregs.

    The attention stage (value-proj + out-proj; softmax over one key == 1) has
    been algebraically folded into w1/b1 in the wrapper, so the kernel body is
    just the MLP: x @ W1f + b1f -> ReLU -> @ W2 + b2 -> ReLU -> @ W3p + b3p.
    """
    h = jnp.dot(x_ref[...], w1_ref[...],
                preferred_element_type=jnp.float32) + b1_ref[...]
    h = jnp.maximum(h, 0.0)
    h = jnp.dot(h, w2_ref[...],
                preferred_element_type=jnp.float32) + b2_ref[...]
    h = jnp.maximum(h, 0.0)
    out_ref[...] = jnp.dot(h, w3_ref[...],
                           preferred_element_type=jnp.float32) + b3_ref[...]


def init_params(key):
    """Deterministic synthetic parameters matching the torch module shapes."""
    ks = jax.random.split(key, 10)
    p = {}
    # 5 x nn.MultiheadAttention(embed_dim=E, num_heads=4)
    #   in_proj_weight: (3E, E), in_proj_bias: (3E,)
    #   out_proj.weight: (E, E), out_proj.bias: (E,)
    p["in_proj_w"] = 0.1 * jax.random.normal(ks[0], (NUM_LEVELS, 3 * EMB_DIM, EMB_DIM), jnp.float32)
    p["in_proj_b"] = 0.1 * jax.random.normal(ks[1], (NUM_LEVELS, 3 * EMB_DIM), jnp.float32)
    p["out_proj_w"] = 0.1 * jax.random.normal(ks[2], (NUM_LEVELS, EMB_DIM, EMB_DIM), jnp.float32)
    p["out_proj_b"] = 0.1 * jax.random.normal(ks[3], (NUM_LEVELS, EMB_DIM), jnp.float32)
    # MLP(5E -> h1 -> h2 -> 4), torch nn.Linear layout (out, in)
    p["w1"] = 0.1 * jax.random.normal(ks[4], (MLP_H1, AGG_DIM), jnp.float32)
    p["b1"] = 0.1 * jax.random.normal(ks[5], (MLP_H1,), jnp.float32)
    p["w2"] = 0.1 * jax.random.normal(ks[6], (MLP_H2, MLP_H1), jnp.float32)
    p["b2"] = 0.1 * jax.random.normal(ks[7], (MLP_H2,), jnp.float32)
    p["w3"] = 0.1 * jax.random.normal(ks[8], (OUT_DIM, MLP_H2), jnp.float32)
    p["b3"] = 0.1 * jax.random.normal(ks[9], (OUT_DIM,), jnp.float32)
    return p


def prepare_fused_params(params):
    """One-time (off the per-call path) algebraic fusion of the attention stage
    into MLP layer 1, plus lane-dense padding of the last layer.

    For level i (softmax over one key == 1):
        att_i  = vis_i @ Wv_i^T @ Wo_i^T + (bv_i @ Wo_i^T + bo_i)
        h1_pre = sum_i att_i @ W1_i^T + b1
    so  K_i = Wv_i^T Wo_i^T W1_i^T  and  c = sum_i (bv_i Wo_i^T + bo_i) W1_i^T + b1.
    """
    E = EMB_DIM
    wv = params["in_proj_w"][:, 2 * E:3 * E, :]      # (5, E, E) value-proj rows, (out, in)
    bv = params["in_proj_b"][:, 2 * E:3 * E]         # (5, E)
    wo = params["out_proj_w"]                        # (5, E, E)
    bo = params["out_proj_b"]                        # (5, E)
    w1 = params["w1"]                                # (h1, 5E)

    k_blocks = []
    c = params["b1"]
    for i in range(NUM_LEVELS):
        w1_i_t = w1[:, i * E:(i + 1) * E].T          # (E, h1)
        k_blocks.append(wv[i].T @ wo[i].T @ w1_i_t)  # (E, h1)
        c = c + (bv[i] @ wo[i].T + bo[i]) @ w1_i_t
    w1_fused = jnp.concatenate(k_blocks, axis=0)     # (5E, h1) lane-dense

    w3_t_pad = jnp.zeros((MLP_H2, OUT_PAD), jnp.float32).at[:, :OUT_DIM].set(params["w3"].T)
    b3_pad = jnp.zeros((1, OUT_PAD), jnp.float32).at[:, :OUT_DIM].set(params["b3"][None, :])

    return {
        "w1": w1_fused,                 # (5E, h1)
        "b1": c[None, :],               # (1, h1)
        "w2": params["w2"].T,           # (h1, h2)
        "b2": params["b2"][None, :],    # (1, h2)
        "w3": w3_t_pad,                 # (h2, 128) zero-padded beyond col 4
        "b3": b3_pad,                   # (1, 128)
    }


@jax.jit
def vg_model_forward(text_feat, vis_feats, fused):
    """text_feat: (B, E) TextEncoder output (mathematically cancelled, unused);
    vis_feats: (B, 5, E) VisualEncoder level outputs, batch-first."""
    del text_feat  # exact: softmax over a single key position is identically 1
    x = vis_feats.reshape(vis_feats.shape[0], AGG_DIM)   # (B, 5E), contiguous reshape

    args = (x, fused["w1"], fused["b1"], fused["w2"], fused["b2"],
            fused["w3"], fused["b3"])
    out_pad = pl.pallas_call(
        vg_kernel,
        out_shape=jax.ShapeDtypeStruct((x.shape[0], OUT_PAD), jnp.float32),
        in_specs=[pl.BlockSpec(memory_space=pltpu.MemorySpace.VMEM)] * len(args),
        out_specs=pl.BlockSpec(memory_space=pltpu.MemorySpace.VMEM),
    )(*args)
    return out_pad[:, :OUT_DIM]


def vg_model_reference(text_feat, vis_feats, params):
    """Pure-JAX reference identical to the torch forward (softmax over 1 key == 1)."""
    del text_feat
    E = EMB_DIM
    wv = params["in_proj_w"][:, 2 * E:3 * E, :]
    bv = params["in_proj_b"][:, 2 * E:3 * E]
    attended = []
    for i in range(NUM_LEVELS):
        v = vis_feats[:, i, :] @ wv[i].T + bv[i]
        attended.append(v @ params["out_proj_w"][i].T + params["out_proj_b"][i])
    agg = jnp.concatenate(attended, axis=-1)
    h = jnp.maximum(agg @ params["w1"].T + params["b1"], 0.0)
    h = jnp.maximum(h @ params["w2"].T + params["b2"], 0.0)
    return h @ params["w3"].T + params["b3"]


if __name__ == "__main__":
    key = jax.random.PRNGKey(0)
    k_param, k_text, k_vis = jax.random.split(key, 3)

    params = init_params(k_param)
    fused = jax.tree_util.tree_map(jax.block_until_ready, prepare_fused_params(params))

    text_feat = jax.random.normal(k_text, (B, EMB_DIM), jnp.float32)             # TextEncoder output
    vis_feats = jax.random.normal(k_vis, (B, NUM_LEVELS, EMB_DIM), jnp.float32)  # 5 VisualEncoder levels

    out = vg_model_forward(text_feat, vis_feats, fused)
    out = jax.block_until_ready(out)

    ref = vg_model_reference(text_feat, vis_feats, params)
    assert out.shape == (B, OUT_DIM), f"bad output shape {out.shape}"
    assert jnp.allclose(out, ref, atol=1e-4, rtol=1e-4), "mismatch vs reference"

    print("KERNEL_OK")
</pallas_src>

<mosaic_0001>
module attributes {stable_mosaic.version = 11 : i64} {
  func.func @vg_kernel(%arg0: memref<2x160xf32, #tpu.memory_space<vmem>>, %arg1: memref<160x64xf32, #tpu.memory_space<vmem>>, %arg2: memref<1x64xf32, #tpu.memory_space<vmem>>, %arg3: memref<64x32xf32, #tpu.memory_space<vmem>>, %arg4: memref<1x32xf32, #tpu.memory_space<vmem>>, %arg5: memref<32x128xf32, #tpu.memory_space<vmem>>, %arg6: memref<1x128xf32, #tpu.memory_space<vmem>>, %arg7: memref<2x128xf32, #tpu.memory_space<vmem>>) attributes {dimension_semantics = [], scalar_prefetch = 0 : i64, scratch_operands = 0 : i64, tpu.core_type = #tpu.core_type<tc>} {
    %c0 = arith.constant 0 : index
    %c0_0 = arith.constant 0 : index
    %0 = vector.load %arg0[%c0, %c0_0] : memref<2x160xf32, #tpu.memory_space<vmem>>, vector<2x160xf32>
    %c0_1 = arith.constant 0 : index
    %c0_2 = arith.constant 0 : index
    %1 = vector.load %arg1[%c0_1, %c0_2] : memref<160x64xf32, #tpu.memory_space<vmem>>, vector<160x64xf32>
    %cst = arith.constant dense<0.000000e+00> : vector<2x64xf32>
    %2 = tpu.matmul %0, %1, %cst {dimension_numbers = #tpu.dot_dimension_numbers<[1], [0], [0], [1], [0, 0, 1, 1], [], []>} : vector<2x160xf32>, vector<160x64xf32>, vector<2x64xf32> -> vector<2x64xf32>
    %c0_3 = arith.constant 0 : index
    %c0_4 = arith.constant 0 : index
    %3 = vector.load %arg2[%c0_3, %c0_4] : memref<1x64xf32, #tpu.memory_space<vmem>>, vector<1x64xf32>
    %4 = vector.broadcast %3 : vector<1x64xf32> to vector<2x64xf32>
    %5 = arith.addf %2, %4 : vector<2x64xf32>
    %cst_5 = arith.constant 0.000000e+00 : f32
    %6 = vector.broadcast %cst_5 : f32 to vector<2x64xf32>
    %7 = arith.maximumf %5, %6 : vector<2x64xf32>
    %c0_6 = arith.constant 0 : index
    %c0_7 = arith.constant 0 : index
    %8 = vector.load %arg3[%c0_6, %c0_7] : memref<64x32xf32, #tpu.memory_space<vmem>>, vector<64x32xf32>
    %cst_8 = arith.constant dense<0.000000e+00> : vector<2x32xf32>
    %9 = tpu.matmul %7, %8, %cst_8 {dimension_numbers = #tpu.dot_dimension_numbers<[1], [0], [0], [1], [0, 0, 1, 1], [], []>} : vector<2x64xf32>, vector<64x32xf32>, vector<2x32xf32> -> vector<2x32xf32>
    %c0_9 = arith.constant 0 : index
    %c0_10 = arith.constant 0 : index
    %10 = vector.load %arg4[%c0_9, %c0_10] : memref<1x32xf32, #tpu.memory_space<vmem>>, vector<1x32xf32>
    %11 = vector.broadcast %10 : vector<1x32xf32> to vector<2x32xf32>
    %12 = arith.addf %9, %11 : vector<2x32xf32>
    %cst_11 = arith.constant 0.000000e+00 : f32
    %13 = vector.broadcast %cst_11 : f32 to vector<2x32xf32>
    %14 = arith.maximumf %12, %13 : vector<2x32xf32>
    %c0_12 = arith.constant 0 : index
    %c0_13 = arith.constant 0 : index
    %15 = vector.load %arg5[%c0_12, %c0_13] : memref<32x128xf32, #tpu.memory_space<vmem>>, vector<32x128xf32>
    %cst_14 = arith.constant dense<0.000000e+00> : vector<2x128xf32>
    %16 = tpu.matmul %14, %15, %cst_14 {dimension_numbers = #tpu.dot_dimension_numbers<[1], [0], [0], [1], [0, 0, 1, 1], [], []>} : vector<2x32xf32>, vector<32x128xf32>, vector<2x128xf32> -> vector<2x128xf32>
    %c0_15 = arith.constant 0 : index
    %c0_16 = arith.constant 0 : index
    %17 = vector.load %arg6[%c0_15, %c0_16] : memref<1x128xf32, #tpu.memory_space<vmem>>, vector<1x128xf32>
    %18 = vector.broadcast %17 : vector<1x128xf32> to vector<2x128xf32>
    %19 = arith.addf %16, %18 : vector<2x128xf32>
    %c0_17 = arith.constant 0 : index
    %c0_18 = arith.constant 0 : index
    %20 = vector.load %arg7[%c0_17, %c0_18] : memref<2x128xf32, #tpu.memory_space<vmem>>, vector<2x128xf32>
    tpu.vector_store %arg7[%c0_17, %c0_18], %19 {strides = array<i32>} : memref<2x128xf32, #tpu.memory_space<vmem>>, vector<2x128xf32>,
    return
  }
}

</mosaic_0001>

<bundles_post_ra>
// kernel: vg_model_forward.1
= control target key start
LH: loop header
LB: loop body
LE: loop exit
PB: predicated region body
PF: predicated region fallthrough
CT: control target
= control target key end

     0   :  { %v404_v1 = vmov 0.0   ;;  %vm65_vm0 = vcmask 261120   ;;  %s599_s0 = inlined_call_operand.vmem [shape: f32[2,160], index: 0, kind: input, shape index: {}]   ;;  %s600_s1 = inlined_call_operand.vmem [shape: f32[160,64], index: 1, kind: input, shape index: {}]   ;;  %s601_s2 = inlined_call_operand.vmem [shape: f32[1,64], index: 2, kind: input, shape index: {}]   ;;  %s602_s3 = inlined_call_operand.vmem [shape: f32[64,32], index: 3, kind: input, shape index: {}]   ;;  %s603_s4 = inlined_call_operand.vmem [shape: f32[1,32], index: 4, kind: input, shape index: {}]   ;;  %s604_s5 = inlined_call_operand.vmem [shape: f32[32,128], index: 5, kind: input, shape index: {}]   ;;  %s605_s6 = inlined_call_operand.vmem [shape: f32[1,128], index: 6, kind: input, shape index: {}]   ;;  %s606_s7 = inlined_call_operand.hbm [shape: f32[2,128], index: 7, kind: output, shape index: {}]  }
   0x1   :  { %v43_v0 = vld [vmem:[%s600_s1 + $0x78] sm:$0xff]  ;;  %68 = vmatprep.subr.mxu0 %v404_v1  ;;  %v42_v2 = vld [vmem:[%s600_s1 + $0x70] sm:$0xff]  ;;  %349 = vmatprep.subr.mxu1 %v404_v1  ;;  %v41_v3 = vld [vmem:[%s600_s1 + $0x68] sm:$0xff] }
   0x2   :  { %69 = vmatpush1.msra.mxu0 %v43_v0  ;;  %v40_v4 = vld [vmem:[%s600_s1 + $0x60] sm:$0xff]  ;;  %v39_v6 = vld [vmem:[%s600_s1 + $0x58] sm:$0xff]  ;;  %v145_v9 = vld [vmem:[%s602_s3 + $0x30] sm:$0xff] }
   0x3   :  { %70 = vmatprep.subr.mxu0 %v404_v1  ;;  %v466_v5 = vld.sshfl [vmem:[%s599_s0] sm:$0x33 pattern:$0x76325410]  ;;  %v146_v8 = vld [vmem:[%s602_s3 + $0x38] sm:$0xff]  ;;  %v38_v10 = vld [vmem:[%s600_s1 + $0x50] sm:$0xff] }
   0x4   :  { %71 = vmatpush1.msra.mxu0 %v42_v2  ;;  %v63_v7 = vcombine.high %v466_v5, %v466_v5  ;;  %350 = vmatpush3.msra.mxu1 %v146_v8 }
   0x5   :  { %72 = vmatprep.subr.mxu0 %v404_v1 }
   0x6   :  { %73 = vmatpush1.msra.mxu0 %v41_v3  ;;  %330 = vmatprep.mubr.msk.f32.mxu0 %vm65_vm0, %v63_v7 }
   0x7   :  { %74 = vmatprep.subr.mxu0 %v404_v1 }
   0x8   :  { %75 = vmatpush1.msra.mxu0 %v40_v4 }
   0x9   :  { %76 = vmatprep.subr.mxu0 %v404_v1 }
   0xa   :  { %12 = vsyncpa [#allocation3], 0  ;;  %77 = vmatpush1.msra.mxu0 %v39_v6  ;;  %351 = vmatprep.subr.mxu1 %v404_v1  ;;  %v144_v11 = vld [vmem:[%s602_s3 + $0x28] sm:$0xff]  ;;  %v143_v13 = vld [vmem:[%s602_s3 + $0x20] sm:$0xff]  ;;  %vm405_vm1 = vmmov 0   ;;  %vm154_vm2 = vcmask 523264  }
   0xb   :  { %78 = vmatprep.subr.mxu0 %v404_v1  ;;  %v37_v12 = vld [vmem:[%s600_s1 + $0x48] sm:$0xff]  ;;  %352 = vmatpush3.msra.mxu1 %v145_v9  ;;  %v36_v14 = vld [vmem:[%s600_s1 + $0x40] sm:$0xff]  ;;  %v142_v15 = vld [vmem:[%s602_s3 + $0x18] sm:$0xff]  ;;  %s406_s21 = smov [#allocation2]  }
   0xc   :  { %79 = vmatpush1.msra.mxu0 %v38_v10  ;;  %353 = vmatprep.subr.mxu1 %v404_v1  ;;  %v35_v16 = vld [vmem:[%s600_s1 + $0x38] sm:$0xff]  ;;  %v34_v17 = vld [vmem:[%s600_s1 + $0x30] sm:$0xff]  ;;  %v33_v18 = vld [vmem:[%s600_s1 + $0x28] sm:$0xff]  ;;  %s320_s22 = sshll.u32 %s406_s21, 4  ;;  %s321_s22 = int_to_ptr.vmem [resolvable:$true] %s320_s22 }
   0xd   :  { %80 = vmatprep.subr.mxu0 %v404_v1  ;;  %354 = vmatpush3.msra.mxu1 %v144_v11  ;;  %v32_v19 = vld [vmem:[%s600_s1 + $0x20] sm:$0xff]  ;;  %v31_v20 = vld [vmem:[%s600_s1 + $0x18] sm:$0xff]  ;;  %v30_v21 = vld [vmem:[%s600_s1 + $0x10] sm:$0xff]  ;;  %p387_p1 = scmp.lt.s32.totalorder %s321_s22, %s321_s22 }
   0xe   :  { %81 = vmatpush1.msra.mxu0 %v37_v12  ;;  %355 = vmatprep.subr.mxu1 %v404_v1  ;;  %v29_v22 = vld [vmem:[%s600_s1 + $0x8] sm:$0xff]  ;;  %v28_v23 = vld [vmem:[%s600_s1] sm:$0xff]  ;;  %v47_v24 = vld [vmem:[%s600_s1 + $0x98] sm:$0xff] }
   0xf   :  { %82 = vmatprep.subr.mxu0 %v404_v1  ;;  %356 = vmatpush3.msra.mxu1 %v143_v13  ;;  %v46_v25 = vld [vmem:[%s600_s1 + $0x90] sm:$0xff]  ;;  %v45_v26 = vld [vmem:[%s600_s1 + $0x88] sm:$0xff]  ;;  %v44_v27 = vld [vmem:[%s600_s1 + $0x80] sm:$0xff] }
  0x10   :  { %83 = vmatpush1.msra.mxu0 %v36_v14  ;;  %357 = vmatprep.subr.mxu1 %v404_v1  ;;  %v141_v28 = vld [vmem:[%s602_s3 + $0x10] sm:$0xff]  ;;  %v140_v29 = vld [vmem:[%s602_s3 + $0x8] sm:$0xff]  ;;  %v139_v30 = vld [vmem:[%s602_s3] sm:$0xff] }
  0x11   :  { %84 = vmatprep.subr.mxu0 %v404_v1  ;;  %358 = vmatpush3.msra.mxu1 %v142_v15  ;;  %v328_v31 = vld [vmem:[%s601_s2] ss:$0 sm:$0xff]  ;;  %v232_v36 = vld [vmem:[%s604_s5 + $0x18] sm:$0xff]  ;;  %v231_v37 = vld [vmem:[%s604_s5 + $0x10] sm:$0xff] }
  0x12   :  { %85 = vmatpush1.msra.mxu0 %v35_v16  ;;  %359 = vmatprep.subr.mxu1 %v404_v1  ;;  %v230_v38 = vld [vmem:[%s604_s5 + $0x8] sm:$0xff]  ;;  %v229_v39 = vld [vmem:[%s604_s5] sm:$0xff]  ;;  %s382_s5 = scalar_lea.vmem %s321_s22, 32 }
  0x13   :  { %86 = vmatprep.subr.mxu0 %v404_v1  ;;  %360 = vmatpush3.msra.mxu1 %v141_v28  ;;  %v331_v40 = vld [vmem:[%s603_s4] ss:$0 sm:$0xff]  ;;  %p383_p0 = scmp.ne.s32.totalorder %s321_s22, %s382_s5  ;;  %p388_p2 = scmp.lt.s32.totalorder %s382_s5, %s382_s5 }
  0x14   :  { %87 = vmatpush1.msra.mxu0 %v34_v17  ;;  %361 = vmatprep.subr.mxu1 %v404_v1  ;;  %v333_v45 = vld [vmem:[%s605_s6] ss:$0 sm:$0xff] }
  0x15   :  { %88 = vmatprep.subr.mxu0 %v404_v1  ;;  %362 = vmatpush3.msra.mxu1 %v140_v29  ;;  %p389_p3 = por %p388_p2, %p387_p1 }
  0x16   :  { %89 = vmatpush1.msra.mxu0 %v33_v18  ;;  %363 = vmatprep.subr.mxu1 %v404_v1 }
  0x17   :  { %90 = vmatprep.subr.mxu0 %v404_v1  ;;  %364 = vmatpush3.msra.mxu1 %v139_v30  ;;  %p390_p4 = pnand %p389_p3, %p383_p0 }
  0x18   :  { %91 = vmatpush1.msra.mxu0 %v32_v19  ;;  %365 = vmatprep.mubr.msk.f32.mxu1 %vm405_vm1, %v404_v1 }
  0x19   :  { %92 = vmatprep.subr.mxu0 %v404_v1  ;;  %368 = vmatprep.subr.mxu1 %v404_v1 }
  0x1a   :  { %93 = vmatpush1.msra.mxu0 %v31_v20 }
  0x1b   :  { %94 = vmatprep.subr.mxu0 %v404_v1 }
  0x1c   :  { %95 = vmatpush1.msra.mxu0 %v30_v21 }
  0x1d   :  { %96 = vmatprep.subr.mxu0 %v404_v1 }
  0x1e   :  { %97 = vmatpush1.msra.mxu0 %v29_v22 }
  0x1f   :  { %98 = vmatprep.subr.mxu0 %v404_v1 }
  0x20   :  { %99 = vmatpush1.msra.mxu0 %v28_v23 }
  0x21   :  { %124 = vmatprep.subr.mxu0 %v404_v1 }
  0x22   :  { %125 = vmatpush2.msra.mxu0 %v47_v24 }
  0x23   :  { %126 = vmatprep.subr.mxu0 %v404_v1 }
  0x24   :  { %127 = vmatpush2.msra.mxu0 %v46_v25 }
  0x25   :  { %128 = vmatprep.subr.mxu0 %v404_v1 }
  0x26   :  { %129 = vmatpush2.msra.mxu0 %v45_v26 }
  0x27   :  { %130 = vmatprep.subr.mxu0 %v404_v1 }
  0x28   :  { %131 = vmatpush2.msra.mxu0 %v44_v27 }
  0x29   :  { %133 = vmatmul.mubr.f32.vlgmr.msra.gmra.mxu0 %v466_v5 }
  0xe9   :  { %v134_v32 = vpop.f32.mrf.mxu0 }
  0xea   :  { %v135_v33 = vadd.f32 %v328_v31, %v134_v32 }
  0xeb   :  { %v136_v34 = vpop.f32.mrf.mxu0 }
  0xec   :  { %v138_v35 = vmax.f32 %v135_v33, 0.0 }
  0xee   :  { %366 = vmatmul.mubr.msk.f32.vlgmr.msra.gmra.mxu1 %vm154_vm2, %v138_v35 }
  0xef   :  { %369 = vmatpush3.msra.mxu1 %v232_v36  ;;  %376 = vmatprep.mubr.msk.f32.mxu1 %vm405_vm1, %v404_v1 }
  0xf0   :  { %370 = vmatprep.subr.mxu1 %v404_v1 }
  0xf1   :  { %371 = vmatpush3.msra.mxu1 %v231_v37 }
  0xf2   :  { %372 = vmatprep.subr.mxu1 %v404_v1 }
  0xf3   :  { %373 = vmatpush3.msra.mxu1 %v230_v38 }
  0xf4   :  { %374 = vmatprep.subr.mxu1 %v404_v1 }
  0xf5   :  { %375 = vmatpush3.msra.mxu1 %v229_v39 }
 0x1ae   :  { %v224_v41 = vpop.f32.mrf.mxu1 }
 0x1af   :  { %v225_v42 = vadd.f32 %v331_v40, %v224_v41 }
 0x1b0   :  { %v367_v43 = vpop.f32.mrf.mxu1 }
 0x1b1   :  { %v228_v44 = vmax.f32 %v225_v42, 0.0 }
 0x1b3   :  { %377 = vmatmul.mubr.msk.f32.vlgmr.msra.gmra.mxu1 %vm65_vm0, %v228_v44 }
 0x273   :  { %v309_v46 = vpop.f32.mrf.mxu1 }
 0x274   :  { %v310_v47 = vadd.f32 %v333_v45, %v309_v46 }
 0x275   :  { %v378_v48 = vpop.f32.mrf.mxu1 }
 0x276   :  { %313 = vst [vmem:[#allocation2] sm:$0x3] %v310_v47 }
 0x277   :  { %393 = shalt.err (!%p390_p4)
}
 0x278   :  { %323 = dma.vmem_to_hbm [thread:$0]  %s321_s22, 32, %s606_s7, [#allocation3]  }
 0x279   :  { %402 = dma.done.wait [#allocation3], 32  }
 0x27a   :  { %403 = vsyncadd [#allocation3], 4294967264 }
 0x27b   :  { %327 = vsyncpa [#allocation3], 1 }

</bundles_post_ra>
